<compile_context>
chip_gen: v5e
topology: v5e:2x2
jax: 0.10.0
libtpu: 0.0.40
codegen_flags: <defaults>
</compile_context>

<pallas_src>
import jax
import jax.numpy as jnp
from jax.experimental import pallas as pl
from jax.experimental.pallas import tpu as pltpu

# Raw (PyTorch) feature sizes and padded sizes.
D_IN = 85                   # fc1 in_features (kept un-padded: K=85 matmul)
H1 = 128                    # fc1 out_features (already lane-aligned)
H2_RAW, H2 = 64, 128        # fc2 out_features, padded to 128 for the MXU
D_OUT_RAW, D_OUT = 2, 8     # fc3 out_features, padded only to 8 (tiny writeback)


def mlp_kernel(x_ref, w1_ref, b1_ref, w2_ref, b2_ref, w3_ref, b3_ref, o_ref):
    # x streams from HBM as f32 [tb, 85]; cast to bf16 in VMEM (no wrapper
    # pad/cast pass).  MXU accumulates in f32; bias/ReLU math stays f32.
    x = x_ref[...].astype(jnp.bfloat16)

    # fc1 + bias + ReLU (contracting dim K=85)
    h1 = jnp.dot(x, w1_ref[...], preferred_element_type=jnp.float32)
    h1 = jnp.maximum(h1 + b1_ref[...], 0.0)
    # dropout(p=0.19): identity in eval mode.
    # TODO(synk): training-mode dropout would need pltpu.prng_seed/prng_random_bits.

    # fc2 + bias + ReLU (hidden padded 64 -> 128 with zeros; exact)
    h2 = jnp.dot(h1.astype(jnp.bfloat16), w2_ref[...],
                 preferred_element_type=jnp.float32)
    h2 = jnp.maximum(h2 + b2_ref[...], 0.0)

    # fc3 logits (padded to 8 lanes; real logits are columns 0..1)
    out = jnp.dot(h2.astype(jnp.bfloat16), w3_ref[...],
                  preferred_element_type=jnp.float32)
    o_ref[...] = (out + b3_ref[...]).astype(o_ref.dtype)


def _round_up(n, m):
    return ((n + m - 1) // m) * m


def _pad2(a, rows, cols):
    r, c = a.shape
    return jnp.pad(a, ((0, rows - r), (0, cols - c)))   # zero padding (exact)


def net_forward(x, params, *, tile_b=2048, vmem_limit_bytes=None):
    """x: [B, 85] float32. Returns [B, 2] float32 logits (eval-mode forward).

    tile_b: batch tile size. 2048 fits the default scoped-VMEM limit on
    v5e/v6e/v7x; on v7x (3.2 TB/s HBM, step-overhead bound) raise to 4096-8192
    and pass vmem_limit_bytes (e.g. 48 << 20).
    """
    w1, b1, w2, b2, w3, b3 = params
    B = x.shape[0]

    # Tile size: multiple of 16 (bf16 sublane packing).  If the whole batch
    # fits in one tile, split into two tiles so the "parallel" batch axis has
    # >= 2 grid steps for v7x's two TensorCores.
    b16 = _round_up(max(B, 1), 16)
    if b16 <= tile_b:
        tb = max(16, _round_up((b16 + 1) // 2, 16))
    else:
        tb = _round_up(tile_b, 16)
    b_pad = _round_up(B, tb)

    # Batch padding only (no feature padding / dtype cast of x in the wrapper).
    x_in = x if b_pad == B else jnp.pad(x, ((0, b_pad - B), (0, 0)))

    # Weights/biases are tiny: pad once (exact zero rows/cols), bf16 weights,
    # f32 biases; they stay VMEM-resident across the grid via constant maps.
    w1_p = w1.astype(jnp.bfloat16)                      # (85, 128)
    w2_p = _pad2(w2, H1, H2).astype(jnp.bfloat16)       # (128, 128)
    w3_p = _pad2(w3, H2, D_OUT).astype(jnp.bfloat16)    # (128, 8)
    b1_p = b1.astype(jnp.float32)                       # (1, 128)
    b2_p = _pad2(b2, 1, H2).astype(jnp.float32)         # (1, 128)
    b3_p = _pad2(b3, 1, D_OUT).astype(jnp.float32)      # (1, 8)

    grid = (b_pad // tb,)
    const = lambda shape: pl.BlockSpec(shape, lambda i: (0, 0))

    flops = 2 * b_pad * (D_IN * H1 + H1 * H2 + H2 * D_OUT)
    bytes_accessed = (
        b_pad * D_IN * 4                               # x read (f32)
        + b_pad * D_OUT * 4                            # logits write (f32, 8 wide)
        + (D_IN * H1 + H1 * H2 + H2 * D_OUT) * 2       # weights (bf16)
        + (H1 + H2 + D_OUT) * 4)                       # biases (f32)

    out = pl.pallas_call(
        mlp_kernel,
        out_shape=jax.ShapeDtypeStruct((b_pad, D_OUT), jnp.float32),
        grid=grid,
        in_specs=[
            # x tiled over batch; last dim 85 == full array dim (legal block).
            pl.BlockSpec((tb, D_IN), lambda i: (i, 0)),
            const((D_IN, H1)), const((1, H1)),          # fc1 (VMEM-resident)
            const((H1, H2)), const((1, H2)),            # fc2
            const((H2, D_OUT)), const((1, D_OUT)),      # fc3
        ],
        out_specs=pl.BlockSpec((tb, D_OUT), lambda i: (i, 0)),
        compiler_params=pltpu.CompilerParams(
            dimension_semantics=("parallel",),          # megacore on v7x
            vmem_limit_bytes=vmem_limit_bytes),
        cost_estimate=pl.CostEstimate(
            flops=flops, transcendentals=0, bytes_accessed=bytes_accessed),
    )(x_in, w1_p, b1_p, w2_p, b2_p, w3_p, b3_p)

    return out[:B, :D_OUT_RAW]


def ref_forward(x, params):
    """Pure-JAX reference mirroring the kernel's bf16 streaming math."""
    w1, b1, w2, b2, w3, b3 = params
    bf = lambda a: a.astype(jnp.bfloat16)
    h1 = jnp.maximum(
        jnp.dot(bf(x), bf(w1), preferred_element_type=jnp.float32) + b1, 0.0)
    h2 = jnp.maximum(
        jnp.dot(bf(h1), bf(w2), preferred_element_type=jnp.float32) + b2, 0.0)
    return jnp.dot(bf(h2), bf(w3), preferred_element_type=jnp.float32) + b3


def init_params(key):
    # PyTorch nn.Linear default init: U(-1/sqrt(fan_in), 1/sqrt(fan_in)).
    def linear(key, fan_in, fan_out):
        kw, kb = jax.random.split(key)
        bound = 1.0 / jnp.sqrt(float(fan_in))
        w = jax.random.uniform(kw, (fan_in, fan_out), jnp.float32, -bound, bound)
        b = jax.random.uniform(kb, (1, fan_out), jnp.float32, -bound, bound)
        return w, b

    k1, k2, k3 = jax.random.split(key, 3)
    w1, b1 = linear(k1, D_IN, H1)
    w2, b2 = linear(k2, H1, H2_RAW)
    w3, b3 = linear(k3, H2_RAW, D_OUT_RAW)
    return (w1, b1, w2, b2, w3, b3)


if __name__ == "__main__":
    key = jax.random.PRNGKey(0)
    kp, kx1, kx2 = jax.random.split(key, 3)
    params = init_params(kp)

    # Small-batch check (batch padded 8 -> 16, single tile).
    B = 8
    x = jax.random.normal(kx1, (B, D_IN), jnp.float32)
    out = jax.block_until_ready(net_forward(x, params))
    ref = ref_forward(x, params)
    assert out.shape == (B, 2)
    assert jnp.allclose(out, ref, atol=2e-3, rtol=2e-3), \
        float(jnp.max(jnp.abs(out - ref)))

    # Grid-exercising check: B=200 with tile_b=64 -> 4 tiles + padded tail.
    B2 = 200
    x2 = jax.random.normal(kx2, (B2, D_IN), jnp.float32)
    out2 = jax.block_until_ready(net_forward(x2, params, tile_b=64))
    ref2 = ref_forward(x2, params)
    assert out2.shape == (B2, 2)
    assert jnp.allclose(out2, ref2, atol=2e-3, rtol=2e-3), \
        float(jnp.max(jnp.abs(out2 - ref2)))

    print("KERNEL_OK")
</pallas_src>

<mosaic_0001>
module attributes {stable_mosaic.version = 11 : i64} {
  func.func @mlp_kernel(%arg0: i32, %arg1: memref<16x85xf32, #tpu.memory_space<vmem>>, %arg2: memref<85x128xbf16, #tpu.memory_space<vmem>>, %arg3: memref<1x128xf32, #tpu.memory_space<vmem>>, %arg4: memref<128x128xbf16, #tpu.memory_space<vmem>>, %arg5: memref<1x128xf32, #tpu.memory_space<vmem>>, %arg6: memref<128x8xbf16, #tpu.memory_space<vmem>>, %arg7: memref<1x8xf32, #tpu.memory_space<vmem>>, %arg8: memref<16x8xf32, #tpu.memory_space<vmem>>) attributes {dimension_semantics = [#tpu.dimension_semantics<parallel>], iteration_bounds = array<i64: 1>, scalar_prefetch = 0 : i64, scratch_operands = 0 : i64, tpu.core_type = #tpu.core_type<tc>, window_params = [{transform_indices = @transform_0, window_bounds = array<i64: 16, 85>}, {pipeline_mode = #tpu.pipeline_mode<synchronous>, transform_indices = @transform_1, window_bounds = array<i64: 85, 128>}, {pipeline_mode = #tpu.pipeline_mode<synchronous>, transform_indices = @transform_2, window_bounds = array<i64: 1, 128>}, {pipeline_mode = #tpu.pipeline_mode<synchronous>, transform_indices = @transform_3, window_bounds = array<i64: 128, 128>}, {pipeline_mode = #tpu.pipeline_mode<synchronous>, transform_indices = @transform_4, window_bounds = array<i64: 1, 128>}, {pipeline_mode = #tpu.pipeline_mode<synchronous>, transform_indices = @transform_5, window_bounds = array<i64: 128, 8>}, {pipeline_mode = #tpu.pipeline_mode<synchronous>, transform_indices = @transform_6, window_bounds = array<i64: 1, 8>}, {transform_indices = @transform_7, window_bounds = array<i64: 16, 8>}]} {
    %c0 = arith.constant 0 : index
    %c0_0 = arith.constant 0 : index
    %0 = vector.load %arg1[%c0, %c0_0] : memref<16x85xf32, #tpu.memory_space<vmem>>, vector<16x85xf32>
    %1 = arith.truncf %0 : vector<16x85xf32> to vector<16x85xbf16>
    %c0_1 = arith.constant 0 : index
    %c0_2 = arith.constant 0 : index
    %2 = vector.load %arg2[%c0_1, %c0_2] : memref<85x128xbf16, #tpu.memory_space<vmem>>, vector<85x128xbf16>
    %cst = arith.constant dense<0.000000e+00> : vector<16x128xf32>
    %3 = tpu.matmul %1, %2, %cst {dimension_numbers = #tpu.dot_dimension_numbers<[1], [0], [0], [1], [0, 0, 1, 1], [], []>} : vector<16x85xbf16>, vector<85x128xbf16>, vector<16x128xf32> -> vector<16x128xf32>
    %c0_3 = arith.constant 0 : index
    %c0_4 = arith.constant 0 : index
    %4 = vector.load %arg3[%c0_3, %c0_4] : memref<1x128xf32, #tpu.memory_space<vmem>>, vector<1x128xf32>
    %5 = vector.broadcast %4 : vector<1x128xf32> to vector<16x128xf32>
    %6 = arith.addf %3, %5 : vector<16x128xf32>
    %cst_5 = arith.constant 0.000000e+00 : f32
    %7 = vector.broadcast %cst_5 : f32 to vector<16x128xf32>
    %8 = arith.maximumf %6, %7 : vector<16x128xf32>
    %9 = arith.truncf %8 : vector<16x128xf32> to vector<16x128xbf16>
    %c0_6 = arith.constant 0 : index
    %c0_7 = arith.constant 0 : index
    %10 = vector.load %arg4[%c0_6, %c0_7] : memref<128x128xbf16, #tpu.memory_space<vmem>>, vector<128x128xbf16>
    %cst_8 = arith.constant dense<0.000000e+00> : vector<16x128xf32>
    %11 = tpu.matmul %9, %10, %cst_8 {dimension_numbers = #tpu.dot_dimension_numbers<[1], [0], [0], [1], [0, 0, 1, 1], [], []>} : vector<16x128xbf16>, vector<128x128xbf16>, vector<16x128xf32> -> vector<16x128xf32>
    %c0_9 = arith.constant 0 : index
    %c0_10 = arith.constant 0 : index
    %12 = vector.load %arg5[%c0_9, %c0_10] : memref<1x128xf32, #tpu.memory_space<vmem>>, vector<1x128xf32>
    %13 = vector.broadcast %12 : vector<1x128xf32> to vector<16x128xf32>
    %14 = arith.addf %11, %13 : vector<16x128xf32>
    %cst_11 = arith.constant 0.000000e+00 : f32
    %15 = vector.broadcast %cst_11 : f32 to vector<16x128xf32>
    %16 = arith.maximumf %14, %15 : vector<16x128xf32>
    %17 = arith.truncf %16 : vector<16x128xf32> to vector<16x128xbf16>
    %c0_12 = arith.constant 0 : index
    %c0_13 = arith.constant 0 : index
    %18 = vector.load %arg6[%c0_12, %c0_13] : memref<128x8xbf16, #tpu.memory_space<vmem>>, vector<128x8xbf16>
    %cst_14 = arith.constant dense<0.000000e+00> : vector<16x8xf32>
    %19 = tpu.matmul %17, %18, %cst_14 {dimension_numbers = #tpu.dot_dimension_numbers<[1], [0], [0], [1], [0, 0, 1, 1], [], []>} : vector<16x128xbf16>, vector<128x8xbf16>, vector<16x8xf32> -> vector<16x8xf32>
    %c0_15 = arith.constant 0 : index
    %c0_16 = arith.constant 0 : index
    %20 = vector.load %arg7[%c0_15, %c0_16] : memref<1x8xf32, #tpu.memory_space<vmem>>, vector<1x8xf32>
    %21 = vector.broadcast %20 : vector<1x8xf32> to vector<16x8xf32>
    %22 = arith.addf %19, %21 : vector<16x8xf32>
    %c0_17 = arith.constant 0 : index
    %c0_18 = arith.constant 0 : index
    %23 = vector.load %arg8[%c0_17, %c0_18] : memref<16x8xf32, #tpu.memory_space<vmem>>, vector<16x8xf32>
    tpu.vector_store %arg8[%c0_17, %c0_18], %22 {strides = array<i32>} : memref<16x8xf32, #tpu.memory_space<vmem>>, vector<16x8xf32>,
    return
  }
  func.func @transform_0(%arg0: i32) -> (i32, i32) {
    %c0_i32 = arith.constant 0 : i32
    %c0_i32_0 = arith.constant 0 : i32
    return %arg0, %c0_i32 : i32, i32
  }
  func.func @transform_1(%arg0: i32) -> (i32, i32) {
    %c0_i32 = arith.constant 0 : i32
    %c0_i32_0 = arith.constant 0 : i32
    %c0_i32_1 = arith.constant 0 : i32
    return %c0_i32, %c0_i32_0 : i32, i32
  }
  func.func @transform_2(%arg0: i32) -> (i32, i32) {
    %c0_i32 = arith.constant 0 : i32
    %c0_i32_0 = arith.constant 0 : i32
    %c0_i32_1 = arith.constant 0 : i32
    return %c0_i32, %c0_i32_0 : i32, i32
  }
  func.func @transform_3(%arg0: i32) -> (i32, i32) {
    %c0_i32 = arith.constant 0 : i32
    %c0_i32_0 = arith.constant 0 : i32
    %c0_i32_1 = arith.constant 0 : i32
    return %c0_i32, %c0_i32_0 : i32, i32
  }
  func.func @transform_4(%arg0: i32) -> (i32, i32) {
    %c0_i32 = arith.constant 0 : i32
    %c0_i32_0 = arith.constant 0 : i32
    %c0_i32_1 = arith.constant 0 : i32
    return %c0_i32, %c0_i32_0 : i32, i32
  }
  func.func @transform_5(%arg0: i32) -> (i32, i32) {
    %c0_i32 = arith.constant 0 : i32
    %c0_i32_0 = arith.constant 0 : i32
    %c0_i32_1 = arith.constant 0 : i32
    return %c0_i32, %c0_i32_0 : i32, i32
  }
  func.func @transform_6(%arg0: i32) -> (i32, i32) {
    %c0_i32 = arith.constant 0 : i32
    %c0_i32_0 = arith.constant 0 : i32
    %c0_i32_1 = arith.constant 0 : i32
    return %c0_i32, %c0_i32_0 : i32, i32
  }
  func.func @transform_7(%arg0: i32) -> (i32, i32) {
    %c0_i32 = arith.constant 0 : i32
    %c0_i32_0 = arith.constant 0 : i32
    return %arg0, %c0_i32 : i32, i32
  }
}

</mosaic_0001>

<bundles_post_ra>
// kernel: tpu_custom_call.1
= control target key start
LH: loop header
LB: loop body
LE: loop exit
PB: predicated region body
PF: predicated region fallthrough
CT: control target
= control target key end

     0   :  { %12 = vsyncpa [#allocation3], 0  ;;  %s598_s0 = inlined_call_operand.hbm [shape: f32[16,85], index: 0, kind: input, shape index: {}]   ;;  %s599_s1 = inlined_call_operand.hbm [shape: bf16[85,128], index: 1, kind: input, shape index: {}]   ;;  %s600_s2 = inlined_call_operand.vmem [shape: f32[1,128], index: 2, kind: input, shape index: {}]   ;;  %s601_s3 = inlined_call_operand.vmem [shape: bf16[128,128], index: 3, kind: input, shape index: {}]   ;;  %s602_s4 = inlined_call_operand.vmem [shape: f32[1,128], index: 4, kind: input, shape index: {}]   ;;  %s603_s5 = inlined_call_operand.vmem [shape: bf16[128,8], index: 5, kind: input, shape index: {}]   ;;  %s604_s6 = inlined_call_operand.vmem [shape: f32[1,8], index: 6, kind: input, shape index: {}]   ;;  %s605_s7 = inlined_call_operand.vmem [shape: f32[16,8], index: 7, kind: output, shape index: {}]  }
   0x1   :  { %s18_s26 = sshll.u32 %s598_s0, 4  ;;  %s19_s26 = int_to_ptr.hbm [resolvable:$true] %s18_s26 }
   0x2   :  { %13 = vsyncpa [#allocation5], 0  ;;  %s482_s27 = smov [#allocation2]   ;;  %s31_s8 = sshll.u32 %s599_s1, 4  ;;  %s32_s8 = int_to_ptr.hbm [resolvable:$true] %s31_s8 }
   0x3   :  { %s20_s28 = sshll.u32 %s482_s27, 4  ;;  %s483_s9 = smov 128   ;;  %s21_s28 = int_to_ptr.vmem [resolvable:$true] %s20_s28 }
   0x4   :  { %s484_s10 = smov 8   ;;  %s485_s11 = smov [#allocation4]  }
   0x5   :  { %26 = dma.hbm_to_vmem [thread:$0]  %s19_s26, 256, %s21_s28, [#allocation3], %s483_s9, %s483_s9, %s484_s10  }
   0x6   :  { %s33_s12 = sshll.u32 %s485_s11, 4  ;;  %s486_s13 = smov 64   ;;  %s34_s12 = int_to_ptr.vmem [resolvable:$true] %s33_s12 }
   0x7   :  { %s487_s14 = smov 4  }
   0x8   :  { %39 = dma.hbm_to_vmem [thread:$0]  %s32_s8, 704, %s34_s12, [#allocation5], %s486_s13, %s486_s13, %s487_s14  }
   0x9   :  { %478 = dma.done.wait [#allocation3], 256  }
   0xa   :  { %479 = vsyncadd [#allocation3], 4294967040 }
   0xb   :  { %480 = dma.done.wait [#allocation5], 704  }
   0xc   :  { %481 = vsyncadd [#allocation5], 4294966592  ;;  %vm114_vm0 = vcmask 1041408   ;;  %vm115_vm1 = vcmask 1042432   ;;  %v488_v0 = vmov 65535   ;;  %v411_v5 = vld [vmem:[%s601_s3 + $0x38] sm:$0xff] }
   0xd   :  { %v116_v1 = vsel %vm114_vm0, 4294967295, %v488_v0  ;;  %v72_v2 = vld [vmem:[#allocation4 + $0x28] sm:$0x7]  ;;  %206 = vmatpush.bf16.msra.mxu1 %v411_v5  ;;  %v410_v7 = vld [vmem:[%s601_s3 + $0x30] sm:$0xff]  ;;  %v409_v10 = vld [vmem:[%s601_s3 + $0x28] sm:$0xff]  ;;  %vm110_vm2 = vcmask 695296  }
   0xe   :  { %v98_v3 = vunpack.c.l.b16 %v72_v2  ;;  %v117_v4 = vsel %vm115_vm1, %v116_v1, 0  ;;  %v403_v9 = vld [vmem:[#allocation4 + $0x20] sm:$0xff]  ;;  %v402_v11 = vld [vmem:[#allocation4 + $0x18] sm:$0xff]  ;;  %v408_v12 = vld [vmem:[%s601_s3 + $0x20] sm:$0xff]  ;;  %vm305_vm3 = vcmask 64512  }
   0xf   :  { %v401_v13 = vld [vmem:[#allocation4 + $0x10] sm:$0xff]  ;;  %v400_v14 = vld [vmem:[#allocation4 + $0x8] sm:$0xff]  ;;  %v399_v15 = vld [vmem:[#allocation4] sm:$0xff] }
  0x10   :  { %v104_v6 = vpack.c.b16 %v98_v3, %v98_v3  ;;  %v59_v16 = vld [vmem:[#allocation2] sm:$0xff]  ;;  %v60_v17 = vld [vmem:[#allocation2 + $0x8] sm:$0xff]  ;;  %v407_v19 = vld [vmem:[%s601_s3 + $0x18] sm:$0xff] }
  0x11   :  { %207 = vmatpush.bf16.msra.mxu1 %v410_v7  ;;  %v61_v18 = vpack.c.bf16 %v60_v17, %v59_v16  ;;  %v406_v20 = vld [vmem:[%s601_s3 + $0x10] sm:$0xff]  ;;  %v405_v21 = vld [vmem:[%s601_s3 + $0x8] sm:$0xff]  ;;  %v404_v22 = vld [vmem:[%s601_s3] sm:$0xff] }
  0x12   :  { %v119_v8 = vand.u32 %v117_v4, %v104_v6  ;;  %v419_v23 = vld [vmem:[%s603_s5 + $0x38] sm:$0xff]  ;;  %v418_v24 = vld [vmem:[%s603_s5 + $0x30] sm:$0xff]  ;;  %v417_v25 = vld [vmem:[%s603_s5 + $0x28] sm:$0xff] }
  0x13   :  { %291 = vmatpush.bf16.msra.mxu2 %v419_v23  ;;  %v416_v26 = vld [vmem:[%s603_s5 + $0x20] sm:$0xff]  ;;  %v415_v35 = vld [vmem:[%s603_s5 + $0x18] sm:$0xff]  ;;  %v414_v36 = vld [vmem:[%s603_s5 + $0x10] sm:$0xff] }
  0x14   :  { %123 = vmatpush.bf16.msra.mxu0 %v119_v8  ;;  %v427_v28 = vld [vmem:[%s600_s2] ss:$0 sm:$0xff]  ;;  %v413_v37 = vld [vmem:[%s603_s5 + $0x8] sm:$0xff] }
  0x15   :  { %208 = vmatpush.bf16.msra.mxu1 %v409_v10  ;;  %v412_v38 = vld [vmem:[%s603_s5] sm:$0xff] }
  0x16   :  { %v428_v40 = vld [vmem:[%s602_s4] ss:$0 sm:$0xff] }
  0x17   :  { %292 = vmatpush.bf16.msra.mxu2 %v418_v24  ;;  %v429_v47 = vld [vmem:[%s604_s6] ss:$0 sm:$0xff] }
  0x18   :  { %124 = vmatpush.bf16.msra.mxu0 %v403_v9 }
  0x19   :  { %209 = vmatpush.bf16.msra.mxu1 %v408_v12 }
  0x1b   :  { %293 = vmatpush.bf16.msra.mxu2 %v417_v25 }
  0x1c   :  { %125 = vmatpush.bf16.msra.mxu0 %v402_v11 }
  0x1d   :  { %210 = vmatpush.bf16.msra.mxu1 %v407_v19 }
  0x1f   :  { %294 = vmatpush.bf16.msra.mxu2 %v416_v26 }
  0x20   :  { %126 = vmatpush.bf16.msra.mxu0 %v401_v13 }
  0x21   :  { %211 = vmatpush.bf16.msra.mxu1 %v406_v20 }
  0x23   :  { %295 = vmatpush.bf16.msra.mxu2 %v415_v35 }
  0x24   :  { %127 = vmatpush.bf16.msra.mxu0 %v400_v14 }
  0x25   :  { %212 = vmatpush.bf16.msra.mxu1 %v405_v21 }
  0x27   :  { %296 = vmatpush.bf16.msra.mxu2 %v414_v36 }
  0x28   :  { %128 = vmatpush.bf16.msra.mxu0 %v399_v15 }
  0x29   :  { %213 = vmatpush.bf16.msra.mxu1 %v404_v22 }
  0x2b   :  { %334 = vmatmul.msk.bf16.vlgmr.msra.gmra.mxu0 %vm110_vm2, %v61_v18  ;;  %297 = vmatpush.bf16.msra.mxu2 %v413_v37 }
  0x2f   :  { %298 = vmatpush.bf16.msra.mxu2 %v412_v38 }
  0xa8   :  { %v130_v27 = vpop.f32.mrf.mxu0 }
  0xa9   :  { %v131_v29 = vadd.f32 %v427_v28, %v130_v27 }
  0xab   :  { %v135_v32 = vmax.f32 %v131_v29, 0.0 }
  0xb0   :  { %v132_v30 = vpop.f32.mrf.mxu0 }
  0xb1   :  { %v133_v31 = vadd.f32 %v427_v28, %v132_v30 }
  0xb3   :  { %v136_v33 = vmax.f32 %v133_v31, 0.0 }
  0xb5   :  { %v137_v34 = vpack.c.bf16 %v136_v33, %v135_v32 }
  0xb7   :  { %214 = vmatmul.bf16.vlgmr.msra.gmra.mxu1 %v137_v34 }
 0x134   :  { %v215_v39 = vpop.f32.mrf.mxu1 }
 0x135   :  { %v216_v41 = vadd.f32 %v428_v40, %v215_v39 }
 0x137   :  { %v220_v44 = vmax.f32 %v216_v41, 0.0 }
 0x13c   :  { %v217_v42 = vpop.f32.mrf.mxu1 }
 0x13d   :  { %v218_v43 = vadd.f32 %v428_v40, %v217_v42 }
 0x13f   :  { %v221_v45 = vmax.f32 %v218_v43, 0.0 }
 0x141   :  { %v222_v46 = vpack.c.bf16 %v221_v45, %v220_v44 }
 0x143   :  { %299 = vmatmul.bf16.vlgmr.msra.gmra.mxu2 %v222_v46 }
 0x1c6   :  { %v300_v48 = vpop.f32.mrf.mxu2 }
 0x1c7   :  { %v301_v49 = vadd.f32 %v429_v47, %v300_v48 }
 0x1c9   :  { %306 = vst.msk [vmem:[%s605_s7] sm:$0xff] %vm305_vm3, %v301_v49 }
 0x1ce   :  { %v302_v50 = vpop.f32.mrf.mxu2 }
 0x1cf   :  { %v303_v51 = vadd.f32 %v429_v47, %v302_v50 }
 0x1d1   :  { %307 = vst.msk [vmem:[%s605_s7 + $0x8] sm:$0xff] %vm305_vm3, %v303_v51 }
 0x1d2   :  { %312 = vsyncpa [#allocation3], 1 }
 0x1d3   :  { %313 = vsyncpa [#allocation5], 1 }

</bundles_post_ra>
